<compile_context>
chip_gen: v7x
topology: tpu7x:2x2x1
jax: 0.10.0
libtpu: 0.0.40
codegen_flags: <defaults>
</compile_context>

<pallas_src>
import functools

import jax
import jax.numpy as jnp
from jax import lax
from jax.experimental import pallas as pl
from jax.experimental.pallas import tpu as pltpu


def _attention_kernel(q_ref, k_ref, v_ref,
                      wq_ref, wk_ref, wv_ref,
                      wo_ref, bo_ref,
                      o_ref, acc_ref, pv_ref,
                      *, heads_per_group, head_dim):
    hg = pl.program_id(2)

    @pl.when(hg == 0)
    def _():
        acc_ref[...] = jnp.zeros_like(acc_ref)

    xq = q_ref[0]           # (tN, C) bf16
    xk = k_ref[0]           # (S,  C) bf16
    xv = v_ref[0]           # (S,  C) bf16
    wq = wq_ref[hg]         # (C, Gd) bf16  (softmax scale pre-folded)
    wk = wk_ref[hg]         # (C, Gd) bf16
    wv = wv_ref[hg]         # (C, Gd) bf16
    wo = wo_ref[hg]         # (Gd, Co_pad) bf16

    # Group projections: full-width MXU matmuls (bf16 in, f32 accumulate).
    qh = jnp.dot(xq, wq, preferred_element_type=jnp.float32
                 ).astype(jnp.bfloat16)                               # (tN, Gd)
    # K produced already transposed -> (Gd, S): QK^T becomes a plain NN matmul.
    khT = lax.dot_general(wk, xk, (((0,), (1,)), ((), ())),
                          preferred_element_type=jnp.float32
                          ).astype(jnp.bfloat16)                      # (Gd, S)
    vh = jnp.dot(xv, wv, preferred_element_type=jnp.float32
                 ).astype(jnp.bfloat16)                               # (S, Gd)

    # Per-head attention inside the group (short static unroll).
    for j in range(heads_per_group):
        lo = j * head_dim
        q_j = qh[:, lo:lo + head_dim]                                 # (tN, dh)
        kT_j = khT[lo:lo + head_dim, :]                               # (dh, S)
        v_j = vh[:, lo:lo + head_dim]                                 # (S, dh)

        s = jnp.dot(q_j, kT_j, preferred_element_type=jnp.float32)    # (tN, S)
        s = s - jnp.max(s, axis=-1, keepdims=True)
        p = jnp.exp(s)
        p = p * pl.reciprocal(jnp.sum(p, axis=-1, keepdims=True), approx=True)

        pv_j = jnp.dot(p.astype(jnp.bfloat16), v_j,
                       preferred_element_type=jnp.float32)            # (tN, dh)
        pv_ref[:, lo:lo + head_dim] = pv_j.astype(jnp.bfloat16)

    # Fused group slice of the output projection: (tN, Gd) @ (Gd, Co_pad), f32 acc.
    acc_ref[...] += jnp.dot(pv_ref[...], wo, preferred_element_type=jnp.float32)

    @pl.when(hg == pl.num_programs(2) - 1)
    def _():
        # Projection bias added exactly once per (batch, query-tile) output block.
        o_ref[0] = (acc_ref[...] + bo_ref[...]).astype(o_ref.dtype)


def _vmem_limit_bytes():
    cap = None
    try:
        cap = getattr(pltpu.get_tpu_info(), "vmem_capacity_bytes", None)
    except Exception:
        cap = None
    if not cap:
        cap = 64 * 1024 * 1024  # conservative default (v7x per-TC VMEM)
    # Leave compiler headroom: ~75% of physical, capped at 100 MiB.
    return int(min(cap * 3 // 4, 100 * 1024 * 1024))


def _pick_query_tile(n, max_tile=256):
    """Largest multiple-of-8 tile <= max_tile dividing n (or n itself if small)."""
    if n <= max_tile:
        return n
    for t in range(max_tile, 7, -8):
        if n % t == 0:
            return t
    return n


def _pick_head_group(num_heads, head_dim, target_width=256, max_unroll=8):
    """Largest divisor of H with G*dh <= target_width and G <= max_unroll."""
    g_cap = max(1, min(num_heads, target_width // max(head_dim, 1), max_unroll))
    for g in range(g_cap, 0, -1):
        if num_heads % g == 0:
            return g
    return 1


def attention_forward(query, params, num_heads, key=None, value=None, mask=None):
    """query: (B, N, C). Optional key/value: (B, S, C). Returns (B, N, out_dim)."""
    assert mask is None  # TODO(synk): additive attention mask not implemented
    if key is None:
        key = query
    if value is None:
        value = key

    B, N, C = query.shape
    S = key.shape[1]
    H = num_heads
    dh = C // H
    Co = params["w_proj"].shape[1]
    scale = dh ** (-0.5)

    G = _pick_head_group(H, dh)            # heads per grid step
    Hg = H // G                            # head-group grid extent
    Gd = G * dh                            # group projection width
    tN = _pick_query_tile(N)               # query tile
    n_tiles = N // tN

    # Lane-dense output: pad out_dim to a multiple of 128, slice after pallas_call.
    Co_pad = ((Co + 127) // 128) * 128

    # Grid-invariant, per-group, contiguous bf16 weight slabs (softmax scale folded
    # into Wq — call-constant, zero in-kernel cost).
    wq = (params["w_q"].astype(jnp.float32) * scale
          ).reshape(C, Hg, Gd).transpose(1, 0, 2).astype(jnp.bfloat16)      # (Hg, C, Gd)
    wk = params["w_k"].reshape(C, Hg, Gd).transpose(1, 0, 2).astype(jnp.bfloat16)
    wv = params["w_v"].reshape(C, Hg, Gd).transpose(1, 0, 2).astype(jnp.bfloat16)

    wo_full = params["w_proj"].astype(jnp.float32)
    bo_full = params["b_proj"].astype(jnp.float32)
    if Co_pad != Co:
        wo_full = jnp.pad(wo_full, ((0, 0), (0, Co_pad - Co)))
        bo_full = jnp.pad(bo_full, ((0, 0), (0, Co_pad - Co)))
    wo = wo_full.reshape(Hg, Gd, Co_pad).astype(jnp.bfloat16)               # (Hg, Gd, Co_pad)
    bo = bo_full                                                            # (1, Co_pad) f32

    # bf16 activations at the matmul boundary (halves activation DMA as well).
    qx = query.astype(jnp.bfloat16)
    kx = key.astype(jnp.bfloat16)
    vx = value.astype(jnp.bfloat16)

    out = pl.pallas_call(
        functools.partial(_attention_kernel, heads_per_group=G, head_dim=dh),
        out_shape=jax.ShapeDtypeStruct((B, N, Co_pad), query.dtype),
        grid_spec=pltpu.PrefetchScalarGridSpec(
            num_scalar_prefetch=0,
            grid=(B, n_tiles, Hg),
            in_specs=[
                pl.BlockSpec((1, tN, C), lambda b, n, hg: (b, n, 0)),      # query tile
                pl.BlockSpec((1, S, C), lambda b, n, hg: (b, 0, 0)),       # key
                pl.BlockSpec((1, S, C), lambda b, n, hg: (b, 0, 0)),       # value
                # Grid-invariant weights: DMA'd once, resident in VMEM.
                pl.BlockSpec((Hg, C, Gd), lambda b, n, hg: (0, 0, 0)),     # Wq (all groups)
                pl.BlockSpec((Hg, C, Gd), lambda b, n, hg: (0, 0, 0)),     # Wk
                pl.BlockSpec((Hg, C, Gd), lambda b, n, hg: (0, 0, 0)),     # Wv
                pl.BlockSpec((Hg, Gd, Co_pad), lambda b, n, hg: (0, 0, 0)),  # Wproj
                pl.BlockSpec((1, Co_pad), lambda b, n, hg: (0, 0)),        # proj bias
            ],
            out_specs=pl.BlockSpec((1, tN, Co_pad), lambda b, n, hg: (b, n, 0)),
            scratch_shapes=[
                pltpu.VMEM((tN, Co_pad), jnp.float32),   # output-projection accumulator
                pltpu.VMEM((tN, Gd), jnp.bfloat16),      # per-group PV staging
            ],
        ),
        compiler_params=pltpu.CompilerParams(
            dimension_semantics=("parallel", "parallel", "arbitrary"),
            vmem_limit_bytes=_vmem_limit_bytes(),
        ),
    )(qx, kx, vx, wq, wk, wv, wo, bo)

    if Co_pad != Co:
        out = out[:, :, :Co]
    return out


def _reference(query, key, value, params, num_heads):
    """Pure-JAX f32 reference matching the PyTorch forward (mask=None, eval mode)."""
    B, N, C = query.shape
    S = key.shape[1]
    dh = C // num_heads
    scale = dh ** (-0.5)

    def heads(t, L):
        return t.reshape(B, L, num_heads, dh).transpose(0, 2, 1, 3)

    q = heads(query @ params["w_q"], N)
    k = heads(key @ params["w_k"], S)
    v = heads(value @ params["w_v"], S)
    a = jnp.einsum("bhnd,bhsd->bhns", q, k) * scale
    a = jax.nn.softmax(a, axis=-1)
    o = jnp.einsum("bhns,bhsd->bhnd", a, v).transpose(0, 2, 1, 3).reshape(B, N, C)
    return o @ params["w_proj"] + params["b_proj"][0]


def init_params(rng, dim, num_heads, out_dim=None, dtype=jnp.float32):
    if out_dim is None:
        out_dim = dim
    ks = jax.random.split(rng, 5)
    s = 0.05
    return {
        # Linear weights stored as (in, out) so the kernel computes x @ W.
        "w_q": (s * jax.random.normal(ks[0], (dim, dim))).astype(dtype),
        "w_k": (s * jax.random.normal(ks[1], (dim, dim))).astype(dtype),
        "w_v": (s * jax.random.normal(ks[2], (dim, dim))).astype(dtype),
        "w_proj": (s * jax.random.normal(ks[3], (dim, out_dim))).astype(dtype),
        "b_proj": (s * jax.random.normal(ks[4], (1, out_dim))).astype(dtype),
    }


if __name__ == "__main__":
    B, N, C = 2, 8, 32
    num_heads = 4

    root = jax.random.PRNGKey(0)
    kx, kp = jax.random.split(root)
    x = jax.random.normal(kx, (B, N, C), dtype=jnp.float32)
    params = init_params(kp, C, num_heads)

    out = attention_forward(x, params, num_heads)   # self-attention path
    out = jax.block_until_ready(out)

    ref = _reference(x, x, x, params, num_heads)
    assert out.shape == (B, N, C)
    max_err = float(jnp.max(jnp.abs(out - ref)))
    assert jnp.allclose(out, ref, atol=1e-2, rtol=1e-2), (
        f"mismatch vs pure-JAX reference, max abs err={max_err}")

    print("KERNEL_OK")
</pallas_src>

<mosaic_0001>
module attributes {stable_mosaic.version = 11 : i64} {
  func.func @_attention_kernel(%arg0: i32, %arg1: i32, %arg2: i32, %arg3: memref<1x8x32xbf16, #tpu.memory_space<vmem>>, %arg4: memref<1x8x32xbf16, #tpu.memory_space<vmem>>, %arg5: memref<1x8x32xbf16, #tpu.memory_space<vmem>>, %arg6: memref<1x32x32xbf16, #tpu.memory_space<vmem>>, %arg7: memref<1x32x32xbf16, #tpu.memory_space<vmem>>, %arg8: memref<1x32x32xbf16, #tpu.memory_space<vmem>>, %arg9: memref<1x32x128xbf16, #tpu.memory_space<vmem>>, %arg10: memref<1x128xf32, #tpu.memory_space<vmem>>, %arg11: memref<1x8x128xf32, #tpu.memory_space<vmem>>, %arg12: memref<8x128xf32, #tpu.memory_space<vmem>>, %arg13: memref<8x32xbf16, #tpu.memory_space<vmem>>) attributes {dimension_semantics = [#tpu.dimension_semantics<parallel>, #tpu.dimension_semantics<parallel>, #tpu.dimension_semantics<arbitrary>], iteration_bounds = array<i64: 2, 1, 1>, scalar_prefetch = 0 : i64, scratch_operands = 2 : i64, tpu.core_type = #tpu.core_type<tc>, window_params = [{transform_indices = @transform_0, window_bounds = array<i64: 1, 8, 32>}, {transform_indices = @transform_1, window_bounds = array<i64: 1, 8, 32>}, {transform_indices = @transform_2, window_bounds = array<i64: 1, 8, 32>}, {pipeline_mode = #tpu.pipeline_mode<synchronous>, transform_indices = @transform_3, window_bounds = array<i64: 1, 32, 32>}, {pipeline_mode = #tpu.pipeline_mode<synchronous>, transform_indices = @transform_4, window_bounds = array<i64: 1, 32, 32>}, {pipeline_mode = #tpu.pipeline_mode<synchronous>, transform_indices = @transform_5, window_bounds = array<i64: 1, 32, 32>}, {pipeline_mode = #tpu.pipeline_mode<synchronous>, transform_indices = @transform_6, window_bounds = array<i64: 1, 32, 128>}, {pipeline_mode = #tpu.pipeline_mode<synchronous>, transform_indices = @transform_7, window_bounds = array<i64: 1, 128>}, {transform_indices = @transform_8, window_bounds = array<i64: 1, 8, 128>}]} {
    %c0_i32 = arith.constant 0 : i32
    %0 = arith.cmpi eq, %arg2, %c0_i32 : i32
    %1 = arith.extui %0 : i1 to i32
    %c0_i32_0 = arith.constant 0 : i32
    %2 = arith.cmpi ne, %1, %c0_i32_0 : i32
    scf.if %2 {
      %cst_49 = arith.constant 0.000000e+00 : f32
      %107 = vector.broadcast %cst_49 : f32 to vector<8x128xf32>
      %c0_50 = arith.constant 0 : index
      %c0_51 = arith.constant 0 : index
      %108 = vector.load %arg12[%c0_50, %c0_51] : memref<8x128xf32, #tpu.memory_space<vmem>>, vector<8x128xf32>
      tpu.vector_store %arg12[%c0_50, %c0_51], %107 {strides = array<i32>} : memref<8x128xf32, #tpu.memory_space<vmem>>, vector<8x128xf32>,
    } else {
    }
    %c0 = arith.constant 0 : index
    %c0_1 = arith.constant 0 : index
    %c0_2 = arith.constant 0 : index
    %3 = vector.load %arg3[%c0, %c0_1, %c0_2] : memref<1x8x32xbf16, #tpu.memory_space<vmem>>, vector<1x8x32xbf16>
    %4 = vector.shape_cast %3 : vector<1x8x32xbf16> to vector<8x32xbf16>
    %c0_3 = arith.constant 0 : index
    %c0_4 = arith.constant 0 : index
    %c0_5 = arith.constant 0 : index
    %5 = vector.load %arg4[%c0_3, %c0_4, %c0_5] : memref<1x8x32xbf16, #tpu.memory_space<vmem>>, vector<1x8x32xbf16>
    %6 = vector.shape_cast %5 : vector<1x8x32xbf16> to vector<8x32xbf16>
    %c0_6 = arith.constant 0 : index
    %c0_7 = arith.constant 0 : index
    %c0_8 = arith.constant 0 : index
    %7 = vector.load %arg5[%c0_6, %c0_7, %c0_8] : memref<1x8x32xbf16, #tpu.memory_space<vmem>>, vector<1x8x32xbf16>
    %8 = vector.shape_cast %7 : vector<1x8x32xbf16> to vector<8x32xbf16>
    %9 = arith.index_cast %arg2 : i32 to index
    %c0_9 = arith.constant 0 : index
    %c0_10 = arith.constant 0 : index
    %10 = vector.load %arg6[%9, %c0_9, %c0_10] : memref<1x32x32xbf16, #tpu.memory_space<vmem>>, vector<1x32x32xbf16>
    %11 = vector.shape_cast %10 : vector<1x32x32xbf16> to vector<32x32xbf16>
    %12 = arith.index_cast %arg2 : i32 to index
    %c0_11 = arith.constant 0 : index
    %c0_12 = arith.constant 0 : index
    %13 = vector.load %arg7[%12, %c0_11, %c0_12] : memref<1x32x32xbf16, #tpu.memory_space<vmem>>, vector<1x32x32xbf16>
    %14 = vector.shape_cast %13 : vector<1x32x32xbf16> to vector<32x32xbf16>
    %15 = arith.index_cast %arg2 : i32 to index
    %c0_13 = arith.constant 0 : index
    %c0_14 = arith.constant 0 : index
    %16 = vector.load %arg8[%15, %c0_13, %c0_14] : memref<1x32x32xbf16, #tpu.memory_space<vmem>>, vector<1x32x32xbf16>
    %17 = vector.shape_cast %16 : vector<1x32x32xbf16> to vector<32x32xbf16>
    %18 = arith.index_cast %arg2 : i32 to index
    %c0_15 = arith.constant 0 : index
    %c0_16 = arith.constant 0 : index
    %19 = vector.load %arg9[%18, %c0_15, %c0_16] : memref<1x32x128xbf16, #tpu.memory_space<vmem>>, vector<1x32x128xbf16>
    %20 = vector.shape_cast %19 : vector<1x32x128xbf16> to vector<32x128xbf16>
    %cst = arith.constant dense<0.000000e+00> : vector<8x32xf32>
    %21 = tpu.matmul %4, %11, %cst {dimension_numbers = #tpu.dot_dimension_numbers<[1], [0], [0], [1], [0, 0, 1, 1], [], []>} : vector<8x32xbf16>, vector<32x32xbf16>, vector<8x32xf32> -> vector<8x32xf32>
    %22 = arith.truncf %21 : vector<8x32xf32> to vector<8x32xbf16>
    %cst_17 = arith.constant dense<0.000000e+00> : vector<32x8xf32>
    %23 = tpu.matmul %14, %6, %cst_17 {dimension_numbers = #tpu.dot_dimension_numbers<[0], [1], [1], [0], [0, 1, 1, 0], [], []>} : vector<32x32xbf16>, vector<8x32xbf16>, vector<32x8xf32> -> vector<32x8xf32>
    %24 = arith.truncf %23 : vector<32x8xf32> to vector<32x8xbf16>
    %cst_18 = arith.constant dense<0.000000e+00> : vector<8x32xf32>
    %25 = tpu.matmul %8, %17, %cst_18 {dimension_numbers = #tpu.dot_dimension_numbers<[1], [0], [0], [1], [0, 0, 1, 1], [], []>} : vector<8x32xbf16>, vector<32x32xbf16>, vector<8x32xf32> -> vector<8x32xf32>
    %26 = arith.truncf %25 : vector<8x32xf32> to vector<8x32xbf16>
    %27 = vector.extract_strided_slice %22 {offsets = [0, 0], sizes = [8, 8], strides = [1, 1]} : vector<8x32xbf16> to vector<8x8xbf16>
    %28 = vector.extract_strided_slice %24 {offsets = [0, 0], sizes = [8, 8], strides = [1, 1]} : vector<32x8xbf16> to vector<8x8xbf16>
    %29 = vector.extract_strided_slice %26 {offsets = [0, 0], sizes = [8, 8], strides = [1, 1]} : vector<8x32xbf16> to vector<8x8xbf16>
    %cst_19 = arith.constant dense<0.000000e+00> : vector<8x8xf32>
    %30 = tpu.matmul %27, %28, %cst_19 {dimension_numbers = #tpu.dot_dimension_numbers<[1], [0], [0], [1], [0, 0, 1, 1], [], []>} : vector<8x8xbf16>, vector<8x8xbf16>, vector<8x8xf32> -> vector<8x8xf32>
    %cst_20 = arith.constant dense<0xFF800000> : vector<8xf32>
    %31 = vector.multi_reduction <maximumf>, %30, %cst_20 [1] : vector<8x8xf32> to vector<8xf32>
    %32 = vector.shape_cast %31 : vector<8xf32> to vector<8x1xf32>
    %33 = vector.broadcast %32 : vector<8x1xf32> to vector<8x8xf32>
    %34 = arith.subf %30, %33 : vector<8x8xf32>
    %35 = math.exp %34 : vector<8x8xf32>
    %cst_21 = arith.constant dense<0.000000e+00> : vector<8xf32>
    %36 = vector.multi_reduction <add>, %35, %cst_21 [1] : vector<8x8xf32> to vector<8xf32>
    %37 = vector.shape_cast %36 : vector<8xf32> to vector<8x1xf32>
    %38 = tpu.reciprocal %37 {approx = true} : vector<8x1xf32> -> vector<8x1xf32>
    %39 = vector.broadcast %38 : vector<8x1xf32> to vector<8x8xf32>
    %40 = arith.mulf %35, %39 : vector<8x8xf32>
    %41 = arith.truncf %40 : vector<8x8xf32> to vector<8x8xbf16>
    %cst_22 = arith.constant dense<0.000000e+00> : vector<8x8xf32>
    %42 = tpu.matmul %41, %29, %cst_22 {dimension_numbers = #tpu.dot_dimension_numbers<[1], [0], [0], [1], [0, 0, 1, 1], [], []>} : vector<8x8xbf16>, vector<8x8xbf16>, vector<8x8xf32> -> vector<8x8xf32>
    %43 = arith.truncf %42 : vector<8x8xf32> to vector<8x8xbf16>
    %c0_23 = arith.constant 0 : index
    %c0_24 = arith.constant 0 : index
    %44 = vector.load %arg13[%c0_23, %c0_24] : memref<8x32xbf16, #tpu.memory_space<vmem>>, vector<8x8xbf16>
    tpu.vector_store %arg13[%c0_23, %c0_24], %43 {strides = array<i32>} : memref<8x32xbf16, #tpu.memory_space<vmem>>, vector<8x8xbf16>,
    %45 = vector.extract_strided_slice %22 {offsets = [0, 8], sizes = [8, 8], strides = [1, 1]} : vector<8x32xbf16> to vector<8x8xbf16>
    %46 = vector.extract_strided_slice %24 {offsets = [8, 0], sizes = [8, 8], strides = [1, 1]} : vector<32x8xbf16> to vector<8x8xbf16>
    %47 = vector.extract_strided_slice %26 {offsets = [0, 8], sizes = [8, 8], strides = [1, 1]} : vector<8x32xbf16> to vector<8x8xbf16>
    %cst_25 = arith.constant dense<0.000000e+00> : vector<8x8xf32>
    %48 = tpu.matmul %45, %46, %cst_25 {dimension_numbers = #tpu.dot_dimension_numbers<[1], [0], [0], [1], [0, 0, 1, 1], [], []>} : vector<8x8xbf16>, vector<8x8xbf16>, vector<8x8xf32> -> vector<8x8xf32>
    %cst_26 = arith.constant dense<0xFF800000> : vector<8xf32>
    %49 = vector.multi_reduction <maximumf>, %48, %cst_26 [1] : vector<8x8xf32> to vector<8xf32>
    %50 = vector.shape_cast %49 : vector<8xf32> to vector<8x1xf32>
    %51 = vector.broadcast %50 : vector<8x1xf32> to vector<8x8xf32>
    %52 = arith.subf %48, %51 : vector<8x8xf32>
    %53 = math.exp %52 : vector<8x8xf32>
    %cst_27 = arith.constant dense<0.000000e+00> : vector<8xf32>
    %54 = vector.multi_reduction <add>, %53, %cst_27 [1] : vector<8x8xf32> to vector<8xf32>
    %55 = vector.shape_cast %54 : vector<8xf32> to vector<8x1xf32>
    %56 = tpu.reciprocal %55 {approx = true} : vector<8x1xf32> -> vector<8x1xf32>
    %57 = vector.broadcast %56 : vector<8x1xf32> to vector<8x8xf32>
    %58 = arith.mulf %53, %57 : vector<8x8xf32>
    %59 = arith.truncf %58 : vector<8x8xf32> to vector<8x8xbf16>
    %cst_28 = arith.constant dense<0.000000e+00> : vector<8x8xf32>
    %60 = tpu.matmul %59, %47, %cst_28 {dimension_numbers = #tpu.dot_dimension_numbers<[1], [0], [0], [1], [0, 0, 1, 1], [], []>} : vector<8x8xbf16>, vector<8x8xbf16>, vector<8x8xf32> -> vector<8x8xf32>
    %61 = arith.truncf %60 : vector<8x8xf32> to vector<8x8xbf16>
    %c0_29 = arith.constant 0 : index
    %c8 = arith.constant 8 : index
    %62 = vector.load %arg13[%c0_29, %c8] : memref<8x32xbf16, #tpu.memory_space<vmem>>, vector<8x8xbf16>
    tpu.vector_store %arg13[%c0_29, %c8], %61 {strides = array<i32>} : memref<8x32xbf16, #tpu.memory_space<vmem>>, vector<8x8xbf16>,
    %63 = vector.extract_strided_slice %22 {offsets = [0, 16], sizes = [8, 8], strides = [1, 1]} : vector<8x32xbf16> to vector<8x8xbf16>
    %64 = vector.extract_strided_slice %24 {offsets = [16, 0], sizes = [8, 8], strides = [1, 1]} : vector<32x8xbf16> to vector<8x8xbf16>
    %65 = vector.extract_strided_slice %26 {offsets = [0, 16], sizes = [8, 8], strides = [1, 1]} : vector<8x32xbf16> to vector<8x8xbf16>
    %cst_30 = arith.constant dense<0.000000e+00> : vector<8x8xf32>
    %66 = tpu.matmul %63, %64, %cst_30 {dimension_numbers = #tpu.dot_dimension_numbers<[1], [0], [0], [1], [0, 0, 1, 1], [], []>} : vector<8x8xbf16>, vector<8x8xbf16>, vector<8x8xf32> -> vector<8x8xf32>
    %cst_31 = arith.constant dense<0xFF800000> : vector<8xf32>
    %67 = vector.multi_reduction <maximumf>, %66, %cst_31 [1] : vector<8x8xf32> to vector<8xf32>
    %68 = vector.shape_cast %67 : vector<8xf32> to vector<8x1xf32>
    %69 = vector.broadcast %68 : vector<8x1xf32> to vector<8x8xf32>
    %70 = arith.subf %66, %69 : vector<8x8xf32>
    %71 = math.exp %70 : vector<8x8xf32>
    %cst_32 = arith.constant dense<0.000000e+00> : vector<8xf32>
    %72 = vector.multi_reduction <add>, %71, %cst_32 [1] : vector<8x8xf32> to vector<8xf32>
    %73 = vector.shape_cast %72 : vector<8xf32> to vector<8x1xf32>
    %74 = tpu.reciprocal %73 {approx = true} : vector<8x1xf32> -> vector<8x1xf32>
    %75 = vector.broadcast %74 : vector<8x1xf32> to vector<8x8xf32>
    %76 = arith.mulf %71, %75 : vector<8x8xf32>
    %77 = arith.truncf %76 : vector<8x8xf32> to vector<8x8xbf16>
    %cst_33 = arith.constant dense<0.000000e+00> : vector<8x8xf32>
    %78 = tpu.matmul %77, %65, %cst_33 {dimension_numbers = #tpu.dot_dimension_numbers<[1], [0], [0], [1], [0, 0, 1, 1], [], []>} : vector<8x8xbf16>, vector<8x8xbf16>, vector<8x8xf32> -> vector<8x8xf32>
    %79 = arith.truncf %78 : vector<8x8xf32> to vector<8x8xbf16>
    %c0_34 = arith.constant 0 : index
    %c16 = arith.constant 16 : index
    %80 = vector.load %arg13[%c0_34, %c16] : memref<8x32xbf16, #tpu.memory_space<vmem>>, vector<8x8xbf16>
    tpu.vector_store %arg13[%c0_34, %c16], %79 {strides = array<i32>} : memref<8x32xbf16, #tpu.memory_space<vmem>>, vector<8x8xbf16>,
    %81 = vector.extract_strided_slice %22 {offsets = [0, 24], sizes = [8, 8], strides = [1, 1]} : vector<8x32xbf16> to vector<8x8xbf16>
    %82 = vector.extract_strided_slice %24 {offsets = [24, 0], sizes = [8, 8], strides = [1, 1]} : vector<32x8xbf16> to vector<8x8xbf16>
    %83 = vector.extract_strided_slice %26 {offsets = [0, 24], sizes = [8, 8], strides = [1, 1]} : vector<8x32xbf16> to vector<8x8xbf16>
    %cst_35 = arith.constant dense<0.000000e+00> : vector<8x8xf32>
    %84 = tpu.matmul %81, %82, %cst_35 {dimension_numbers = #tpu.dot_dimension_numbers<[1], [0], [0], [1], [0, 0, 1, 1], [], []>} : vector<8x8xbf16>, vector<8x8xbf16>, vector<8x8xf32> -> vector<8x8xf32>
    %cst_36 = arith.constant dense<0xFF800000> : vector<8xf32>
    %85 = vector.multi_reduction <maximumf>, %84, %cst_36 [1] : vector<8x8xf32> to vector<8xf32>
    %86 = vector.shape_cast %85 : vector<8xf32> to vector<8x1xf32>
    %87 = vector.broadcast %86 : vector<8x1xf32> to vector<8x8xf32>
    %88 = arith.subf %84, %87 : vector<8x8xf32>
    %89 = math.exp %88 : vector<8x8xf32>
    %cst_37 = arith.constant dense<0.000000e+00> : vector<8xf32>
    %90 = vector.multi_reduction <add>, %89, %cst_37 [1] : vector<8x8xf32> to vector<8xf32>
    %91 = vector.shape_cast %90 : vector<8xf32> to vector<8x1xf32>
    %92 = tpu.reciprocal %91 {approx = true} : vector<8x1xf32> -> vector<8x1xf32>
    %93 = vector.broadcast %92 : vector<8x1xf32> to vector<8x8xf32>
    %94 = arith.mulf %89, %93 : vector<8x8xf32>
    %95 = arith.truncf %94 : vector<8x8xf32> to vector<8x8xbf16>
    %cst_38 = arith.constant dense<0.000000e+00> : vector<8x8xf32>
    %96 = tpu.matmul %95, %83, %cst_38 {dimension_numbers = #tpu.dot_dimension_numbers<[1], [0], [0], [1], [0, 0, 1, 1], [], []>} : vector<8x8xbf16>, vector<8x8xbf16>, vector<8x8xf32> -> vector<8x8xf32>
    %97 = arith.truncf %96 : vector<8x8xf32> to vector<8x8xbf16>
    %c0_39 = arith.constant 0 : index
    %c24 = arith.constant 24 : index
    %98 = vector.load %arg13[%c0_39, %c24] : memref<8x32xbf16, #tpu.memory_space<vmem>>, vector<8x8xbf16>
    tpu.vector_store %arg13[%c0_39, %c24], %97 {strides = array<i32>} : memref<8x32xbf16, #tpu.memory_space<vmem>>, vector<8x8xbf16>,
    %c0_40 = arith.constant 0 : index
    %c0_41 = arith.constant 0 : index
    %99 = vector.load %arg12[%c0_40, %c0_41] : memref<8x128xf32, #tpu.memory_space<vmem>>, vector<8x128xf32>
    %c0_42 = arith.constant 0 : index
    %c0_43 = arith.constant 0 : index
    %100 = vector.load %arg13[%c0_42, %c0_43] : memref<8x32xbf16, #tpu.memory_space<vmem>>, vector<8x32xbf16>
    %cst_44 = arith.constant dense<0.000000e+00> : vector<8x128xf32>
    %101 = tpu.matmul %100, %20, %cst_44 {dimension_numbers = #tpu.dot_dimension_numbers<[1], [0], [0], [1], [0, 0, 1, 1], [], []>} : vector<8x32xbf16>, vector<32x128xbf16>, vector<8x128xf32> -> vector<8x128xf32>
    %102 = arith.addf %99, %101 : vector<8x128xf32>
    %c0_45 = arith.constant 0 : index
    %c0_46 = arith.constant 0 : index
    %103 = vector.load %arg12[%c0_45, %c0_46] : memref<8x128xf32, #tpu.memory_space<vmem>>, vector<8x128xf32>
    tpu.vector_store %arg12[%c0_45, %c0_46], %102 {strides = array<i32>} : memref<8x128xf32, #tpu.memory_space<vmem>>, vector<8x128xf32>,
    %c0_i32_47 = arith.constant 0 : i32
    %104 = arith.cmpi eq, %arg2, %c0_i32_47 : i32
    %105 = arith.extui %104 : i1 to i32
    %c0_i32_48 = arith.constant 0 : i32
    %106 = arith.cmpi ne, %105, %c0_i32_48 : i32
    scf.if %106 {
      %c0_49 = arith.constant 0 : index
      %c0_50 = arith.constant 0 : index
      %107 = vector.load %arg12[%c0_49, %c0_50] : memref<8x128xf32, #tpu.memory_space<vmem>>, vector<8x128xf32>
      %c0_51 = arith.constant 0 : index
      %c0_52 = arith.constant 0 : index
      %108 = vector.load %arg10[%c0_51, %c0_52] : memref<1x128xf32, #tpu.memory_space<vmem>>, vector<1x128xf32>
      %109 = vector.broadcast %108 : vector<1x128xf32> to vector<8x128xf32>
      %110 = arith.addf %107, %109 : vector<8x128xf32>
      %c0_53 = arith.constant 0 : index
      %c0_54 = arith.constant 0 : index
      %c0_55 = arith.constant 0 : index
      %111 = vector.load %arg11[%c0_53, %c0_54, %c0_55] : memref<1x8x128xf32, #tpu.memory_space<vmem>>, vector<1x8x128xf32>
      %112 = vector.shape_cast %111 : vector<1x8x128xf32> to vector<8x128xf32>
      %113 = vector.shape_cast %110 : vector<8x128xf32> to vector<1x8x128xf32>
      tpu.vector_store %arg11[%c0_53, %c0_54, %c0_55], %113 {strides = array<i32>} : memref<1x8x128xf32, #tpu.memory_space<vmem>>, vector<1x8x128xf32>,
    } else {
    }
    return
  }
  func.func @transform_0(%arg0: i32, %arg1: i32, %arg2: i32) -> (i32, i32, i32) {
    %c0_i32 = arith.constant 0 : i32
    %c0_i32_0 = arith.constant 0 : i32
    return %arg0, %arg1, %c0_i32 : i32, i32, i32
  }
  func.func @transform_1(%arg0: i32, %arg1: i32, %arg2: i32) -> (i32, i32, i32) {
    %c0_i32 = arith.constant 0 : i32
    %c0_i32_0 = arith.constant 0 : i32
    %c0_i32_1 = arith.constant 0 : i32
    return %arg0, %c0_i32, %c0_i32_0 : i32, i32, i32
  }
  func.func @transform_2(%arg0: i32, %arg1: i32, %arg2: i32) -> (i32, i32, i32) {
    %c0_i32 = arith.constant 0 : i32
    %c0_i32_0 = arith.constant 0 : i32
    %c0_i32_1 = arith.constant 0 : i32
    return %arg0, %c0_i32, %c0_i32_0 : i32, i32, i32
  }
  func.func @transform_3(%arg0: i32, %arg1: i32, %arg2: i32) -> (i32, i32, i32) {
    %c0_i32 = arith.constant 0 : i32
    %c0_i32_0 = arith.constant 0 : i32
    %c0_i32_1 = arith.constant 0 : i32
    %c0_i32_2 = arith.constant 0 : i32
    return %c0_i32, %c0_i32_0, %c0_i32_1 : i32, i32, i32
  }
  func.func @transform_4(%arg0: i32, %arg1: i32, %arg2: i32) -> (i32, i32, i32) {
    %c0_i32 = arith.constant 0 : i32
    %c0_i32_0 = arith.constant 0 : i32
    %c0_i32_1 = arith.constant 0 : i32
    %c0_i32_2 = arith.constant 0 : i32
    return %c0_i32, %c0_i32_0, %c0_i32_1 : i32, i32, i32
  }
  func.func @transform_5(%arg0: i32, %arg1: i32, %arg2: i32) -> (i32, i32, i32) {
    %c0_i32 = arith.constant 0 : i32
    %c0_i32_0 = arith.constant 0 : i32
    %c0_i32_1 = arith.constant 0 : i32
    %c0_i32_2 = arith.constant 0 : i32
    return %c0_i32, %c0_i32_0, %c0_i32_1 : i32, i32, i32
  }
  func.func @transform_6(%arg0: i32, %arg1: i32, %arg2: i32) -> (i32, i32, i32) {
    %c0_i32 = arith.constant 0 : i32
    %c0_i32_0 = arith.constant 0 : i32
    %c0_i32_1 = arith.constant 0 : i32
    %c0_i32_2 = arith.constant 0 : i32
    return %c0_i32, %c0_i32_0, %c0_i32_1 : i32, i32, i32
  }
  func.func @transform_7(%arg0: i32, %arg1: i32, %arg2: i32) -> (i32, i32) {
    %c0_i32 = arith.constant 0 : i32
    %c0_i32_0 = arith.constant 0 : i32
    %c0_i32_1 = arith.constant 0 : i32
    return %c0_i32, %c0_i32_0 : i32, i32
  }
  func.func @transform_8(%arg0: i32, %arg1: i32, %arg2: i32) -> (i32, i32, i32) {
    %c0_i32 = arith.constant 0 : i32
    %c0_i32_0 = arith.constant 0 : i32
    return %arg0, %arg1, %c0_i32 : i32, i32, i32
  }
}

</mosaic_0001>

<bundles_post_ra>
// kernel: tpu_custom_call.1
= control target key start
LH: loop header
LB: loop body
LE: loop exit
PB: predicated region body
PF: predicated region fallthrough
CT: control target
= control target key end

     0   :  { %s2465_s0 = inlined_call_operand.hbm [shape: bf16[2,8,32], index: 0, kind: input, shape index: {}]   ;;  %s2466_s1 = inlined_call_operand.hbm [shape: bf16[2,8,32], index: 1, kind: input, shape index: {}]   ;;  %s2467_s2 = inlined_call_operand.hbm [shape: bf16[2,8,32], index: 2, kind: input, shape index: {}]   ;;  %s2468_s3 = inlined_call_operand.hbm [shape: bf16[1,32,32], index: 3, kind: input, shape index: {}]   ;;  %s2469_s4 = inlined_call_operand.hbm [shape: bf16[1,32,32], index: 4, kind: input, shape index: {}]   ;;  %s2470_s5 = inlined_call_operand.vmem [shape: bf16[1,32,32], index: 5, kind: input, shape index: {}]   ;;  %s2471_s6 = inlined_call_operand.hbm [shape: bf16[1,32,128], index: 6, kind: input, shape index: {}]   ;;  %s2472_s7 = inlined_call_operand.vmem [shape: f32[1,128], index: 7, kind: input, shape index: {}]   ;;  %s2473_s8 = inlined_call_operand.hbm [shape: f32[2,8,128], index: 8, kind: output, shape index: {}]  }
   0x1   :  { %2500 = sst [smem:[#allocation29_spill]] %s2466_s1 }
   0x2   :  { %2501 = sst [smem:[#allocation30_spill]] %s2468_s3 }
   0x3   :  { %2502 = sst [smem:[#allocation31_spill]] %s2472_s7 }
   0x4   :  { %2503 = sst [smem:[#allocation32_spill]] %s2473_s8 }
   0x5   :  { %13 = vsyncpa [#allocation5], 0 }
   0x6   :  { %15 = vsyncpa [#allocation5 + $0x1], 0 }
   0x7   :  { %16 = vsyncpa [#allocation8], 0 }
   0x8   :  { %18 = vsyncpa [#allocation8 + $0x1], 0 }
   0x9   :  { %19 = vsyncpa [#allocation11], 0 }
   0xa   :  { %20 = vsyncpa [#allocation14], 0 }
   0xb   :  { %21 = vsyncpa [#allocation6], 0 }
   0xc   :  { %23 = vsyncpa [#allocation6 + $0x1], 0  ;;  %s2041_s27 = smov 0   ;;  %s2043_s28 = smov 0  }
   0xd   :  { %s2045_s29 = smov 0   ;;  %s2047_s30 = smov 0  }
   0xe   :  { %s2049_s9 = smov 0   ;;  %s2051_s10 = smov 0  }
   0xf LB: > { %2504 = sst [smem:[#allocation21_spill]] %s1957_s27  ;;  %s2072_s11 = sadd.s32 4294967295, %s1977_s10   ;;  %s1977_s10 = sphi %s2051_s10, %s29_s10   ;;  %s1973_s9 = sphi %s2049_s9, %s2549_s9   ;;  %s1969_s30 = sphi %s2047_s30, %s2548_s30   ;;  %s1965_s29 = sphi %s2045_s29, %s2552_s29   ;;  %s1961_s28 = sphi %s2043_s28, %s2551_s28   ;;  %s1957_s27 = sphi %s2041_s27, %s2550_s27  }
  0x10   : > { %2505 = sst [smem:[#allocation22_spill]] %s1969_s30  ;;  %s1412_s12 = sadd.s32 4294967294, %s1977_s10  }
  0x11   : > { %2506 = sst [smem:[#allocation23_spill]] %s1973_s9  ;;  %p70_p0 = scmp.ne.s32.totalorder %s1961_s28, %s1957_s27 }
  0x12   : > { %2507 = sst [smem:[#allocation24_spill]] %s1977_s10  ;;  %p2474_p1 = scmp.eq.s32.totalorder %s2072_s11, 0 }
  0x13   : > { %p259_p3 = scmp.eq.s32.totalorder %s1412_s12, 1  ;;  %p1413_p5 = scmp.ge.s32.totalorder %s1977_s10, 1 }
  0x14   : > { %p2081_p4 = por %p2474_p1, %p70_p0  ;;  %p266_p7 = scmp.lt.s32.totalorder %s1977_s10, 3 }
  0x15   : > { %p2086_p6 = por %p259_p3, %p70_p0  ;;  %s1979_s16 = smov [#allocation10]  }
  0x16   : > { %s2508_s13 = scalar_select %p2081_p4, 1, 0 }
  0x17   : > { %s2509_s14 = scalar_select %p2086_p6, 1, 0 }
  0x18   : > { %p2091_p8 = pnand %p1413_p5, %p266_p7  ;;  %s278_s17 = sshll.u32 %s1979_s16, 4  ;;  %s279_s17 = int_to_ptr.vmem [resolvable:$true] %s278_s17 }
  0x19   : > { %2510 = sst [smem:[#allocation25_spill]] %s2509_s14  ;;  %s48_s19 = sadd.s32 1, %s1973_s9 }
  0x1a   : > { %s2511_s15 = scalar_select %p2091_p8, 1, 0 }
  0x1b   : > { %p1591_p9 = pneg %p2091_p8  ;;  %s2513_s3 = sld [smem:[#allocation30_spill]] }
  0x1d   : > { %p2100_p11 = pnand %p1591_p9, %p2474_p1 }
  0x1f   : > { %s2512_s18 = scalar_select %p2100_p11, 1, 0 }
  0x20   : > { %p2113_p13 = pneg %p2100_p11 }
  0x21   : > { %s1709_s22 = scalar_lea.hbm %s2513_s3, 256 }
  0x22   : > { %p1710_p12 = scmp.ne.s32.totalorder %s2513_s3, %s1709_s22  ;;  %p1716_p5 = scmp.lt.u32.totalorder %s1709_s22, %s2513_s3 }
  0x23   : > { %s2514_s25 = scalar_select %p2113_p13, 1, 0 }
  0x24   : > { %p1712_p0 = pnand %p2113_p13, %p1710_p12 }
  0x26   : > { %p1713_p3 = pneg %p1712_p0 }
  0x28   : > { %p1718_p7 = pnand %p1716_p5, %p1713_p3 }
  0x2a   : > { %1721 = shalt.err (!%p1718_p7)
}
  0x2b   : > { %s1722_s16 = scalar_lea.vmem %s279_s17, 256  ;;  %p1730_p2 = scmp.lt.s32.totalorder %s279_s17, %s279_s17 }
  0x2c   : > { %p1723_p9 = scmp.ne.s32.totalorder %s279_s17, %s1722_s16  ;;  %p1731_p6 = scmp.lt.s32.totalorder %s1722_s16, %s1722_s16 }
  0x2e   : > { %p1725_p10 = pnand %p1723_p9, %p2113_p13  ;;  %p1732_p4 = por %p1731_p6, %p1730_p2 }
  0x30   : > { %p1726_p1 = pneg %p1725_p10 }
  0x32   : > { %p1733_p8 = pnand %p1732_p4, %p1726_p1 }
  0x34   : > { %1736 = shalt.err (!%p1733_p8)
}
  0x35   : > { %s2477_s20 = smov 64   ;;  %s2479_s21 = smov 4  }
  0x36   : > { %1594 = dma.hbm_to_vmem [thread:$0]  (!%p2100_p11), %s2513_s3, 256, %s279_s17, [#allocation11], %s2477_s20, %s2477_s20, %s2479_s21  }
  0x37   : > { %p50_p1 = scmp.ge.s32.totalorder %s48_s19, 2  ;;  %s57_s24 = sadd.s32 1, %s1965_s29 }
  0x38   : > { %p64_p2 = scmp.ne.s32.totalorder %s1965_s29, %s1961_s28  ;;  %p65_p4 = scmp.eq.s32.totalorder %s1977_s10, 0 }
  0x39   : > { %s2554_s19 = smov (%p50_p1, %s48_s19), 0  ;;  %p2516_p8 = scmp.eq.s32.totalorder %s2072_s11, 1 }
  0x3a   : > { %2515 = sst [smem:[#allocation26_spill]] %s2554_s19  ;;  %p66_p6 = por %p65_p4, %p64_p2 }
  0x3b   : > { %p2140_p10 = por %p2516_p8, %p64_p2  ;;  %s52_s12 = ssub.s32 %s1973_s9, %s2554_s19 }
  0x3c   : > { %p1618_p12 = scmp.lt.s32.totalorder %s1977_s10, 2  ;;  %p55_p0 = scmp.eq.s32.totalorder %s52_s12, 0 }
  0x3d   : > { %s2517_s26 = scalar_select %p2140_p10, 1, 0 }
  0x3e   : > { %s2482_s16 = sand.u32 1, %s1965_s29   ;;  %s2153_s22 = sshll.u32 %s1973_s9, 6 }
  0x3f   : > { %2518 = sst [smem:[#allocation27_spill]] %s2517_s26  ;;  %s2150_s17 = sshll.u32 %s2482_s16, 2 }
  0x40   : > { %s2156_s23 = scalar_select %p55_p0, %s1965_s29, %s57_s24  }
  0x41   : > { %p2158_p3 = pnand %p1618_p12, %p66_p6  ;;  %s343_s21 = sand.u32 1, %s1977_s10  }
  0x42   : > { %2519 = sst [smem:[#allocation28_spill]] %s2156_s23  ;;  %s2521_s1 = sld [smem:[#allocation29_spill]] }
  0x43   : > { %s2520_s20 = scalar_select %p2158_p3, 1, 0 }
  0x44   : > { %s347_s16 = scalar_lea.vmem [#allocation7], %s2150_s17  ;;  %s1982_s24 = smov [#allocation12]  }
  0x45   : > { %s354_s9 = sshll.u32 %s347_s16, 4  ;;  %s2172_s23 = sshll.u32 %s1982_s24, 4  ;;  %s2170_s9 = int_to_ptr.vmem [resolvable:$true] %s354_s9  ;;  %s292_s23 = int_to_ptr.vmem [resolvable:$true] %s2172_s23 }
  0x46   : > { %s2174_s14 = scalar_lea.sflag [#allocation8], %s343_s21  ;;  %p2180_p7 = pneg %p2158_p3 }
  0x48   : > { %s2167_s12 = scalar_lea.hbm %s2521_s1, %s2153_s22  ;;  %s1742_s10 = scalar_lea.hbm %s2521_s1, 128 }
  0x49   : > { %s1737_s27 = scalar_lea.hbm %s2167_s12, 64  ;;  %p1743_p2 = scmp.lt.u32.totalorder %s2167_s12, %s2521_s1 }
  0x4a   : > { %p1738_p5 = scmp.ne.s32.totalorder %s2167_s12, %s1737_s27  ;;  %p1744_p4 = scmp.lt.u32.totalorder %s1742_s10, %s1737_s27 }
  0x4b   : > { %s2522_s3 = scalar_select %p2180_p7, 1, 0 }
  0x4c   : > { %p1740_p9 = pnand %p2180_p7, %p1738_p5  ;;  %p1745_p6 = por %p1744_p4, %p1743_p2 }
  0x4d   : > { %p1746_p8 = scmp.lt.u32.totalorder %s1737_s27, %s2167_s12 }
  0x4e   : > { %p1741_p1 = pneg %p1740_p9 }
  0x4f   : > { %p1747_p12 = por %p1746_p8, %p1745_p6 }
  0x51   : > { %p1748_p0 = pnand %p1747_p12, %p1741_p1 }
  0x53   : > { %1751 = shalt.err (!%p1748_p0)
}
  0x54   : > { %s1752_s21 = scalar_lea.vmem %s2170_s9, 64  ;;  %s1983_s19 = smov [#allocation7]  }
  0x55   : > { %p1753_p5 = scmp.ne.s32.totalorder %s2170_s9, %s1752_s21  ;;  %s1757_s16 = sshll.u32 %s1983_s19, 4  ;;  %s1758_s16 = int_to_ptr.vmem [resolvable:$false] %s1757_s16 }
  0x56   : > { %s1759_s8 = scalar_lea.vmem %s1758_s16, 128  ;;  %p1760_p11 = scmp.lt.s32.totalorder %s2170_s9, %s1758_s16 }
  0x57   : > { %p1755_p9 = pnand %p1753_p5, %p2180_p7  ;;  %p1761_p13 = scmp.lt.s32.totalorder %s1759_s8, %s1752_s21 }
  0x59   : > { %p1756_p10 = pneg %p1755_p9  ;;  %p1762_p2 = por %p1761_p13, %p1760_p11 }
  0x5b   : > { %p1763_p4 = pnand %p1762_p2, %p1756_p10 }
  0x5d   : > { %1766 = shalt.err (!%p1763_p4)
}
  0x5e   : > { %1607 = dma.hbm_to_vmem [thread:$0]  (!%p2158_p3), %s2167_s12, 64, %s2170_s9, %s2174_s14  }
  0x5f   : > { %s1767_s24 = scalar_lea.hbm %s2469_s4, 256  ;;  %p2523_p11 = scmp.ne.s32.totalorder %s2514_s25, 0 }
  0x60   : > { %p1768_p1 = scmp.ne.s32.totalorder %s2469_s4, %s1767_s24  ;;  %p1774_p6 = scmp.lt.u32.totalorder %s1767_s24, %s2469_s4 }
  0x62   : > { %p1770_p13 = pnand %p1768_p1, %p2523_p11 }
  0x64   : > { %p1771_p10 = pneg %p1770_p13 }
  0x66   : > { %p1776_p8 = pnand %p1774_p6, %p1771_p10 }
  0x68   : > { %1779 = shalt.err (!%p1776_p8)
}
  0x69   : > { %s1780_s8 = scalar_lea.vmem %s292_s23, 256  ;;  %p1788_p9 = scmp.lt.s32.totalorder %s292_s23, %s292_s23 }
  0x6a   : > { %p1781_p12 = scmp.ne.s32.totalorder %s292_s23, %s1780_s8  ;;  %p1789_p2 = scmp.lt.s32.totalorder %s1780_s8, %s1780_s8 }
  0x6c   : > { %p1783_p0 = pnand %p1781_p12, %p2523_p11  ;;  %p1790_p4 = por %p1789_p2, %p1788_p9 }
  0x6e   : > { %p1784_p5 = pneg %p1783_p0 }
  0x70   : > { %p1791_p3 = pnand %p1790_p4, %p1784_p5 }
  0x72   : > { %1794 = shalt.err (!%p1791_p3)
}
  0x73   : > { %p2524_p1 = scmp.ne.s32.totalorder %s2512_s18, 0  ;;  %s2525_s1 = smov 4  }
  0x74   : > { %s2526_s9 = smov 64   ;;  %s1984_s10 = smov [#allocation13]  }
  0x75   : > { %1597 = dma.hbm_to_vmem [thread:$0]  (!%p2524_p1), %s2469_s4, 256, %s292_s23, [#allocation11], %s2526_s9, %s2526_s9, %s2525_s1  }
  0x76   : > { %s307_s24 = sshll.u32 %s1984_s10, 4  ;;  %s1795_s16 = scalar_lea.hbm %s2471_s6, 256  ;;  %s308_s24 = int_to_ptr.vmem [resolvable:$true] %s307_s24 }
  0x77   : > { %p1796_p3 = scmp.ne.s32.totalorder %s2471_s6, %s1795_s16  ;;  %p1802_p6 = scmp.lt.u32.totalorder %s1795_s16, %s2471_s6 }
  0x79   : > { %p1798_p13 = pnand %p1796_p3, %p2523_p11 }
  0x7b   : > { %p1799_p10 = pneg %p1798_p13 }
  0x7d   : > { %p1804_p8 = pnand %p1802_p6, %p1799_p10 }
  0x7f   : > { %1807 = shalt.err (!%p1804_p8)
}
  0x80   : > { %s1808_s23 = scalar_lea.vmem %s308_s24, 256  ;;  %p1816_p9 = scmp.lt.s32.totalorder %s308_s24, %s308_s24 }
  0x81   : > { %p1809_p12 = scmp.ne.s32.totalorder %s308_s24, %s1808_s23  ;;  %p1817_p2 = scmp.lt.s32.totalorder %s1808_s23, %s1808_s23 }
  0x83   : > { %p1811_p0 = pnand %p1809_p12, %p2523_p11  ;;  %p1818_p4 = por %p1817_p2, %p1816_p9 }
  0x85   : > { %p1812_p5 = pneg %p1811_p0 }
  0x87   : > { %p1819_p7 = pnand %p1818_p4, %p1812_p5 }
  0x89   : > { %1822 = shalt.err (!%p1819_p7)
}
  0x8a   : > { %1600 = dma.hbm_to_vmem [thread:$0]  (!%p2524_p1), %s2471_s6, 256, %s308_s24, [#allocation14], %s2526_s9, %s2526_s9, %s2525_s1  }
  0x8b   : > { %s2251_s12 = scalar_lea.hbm %s2465_s0, %s2153_s22  ;;  %s328_s18 = scalar_lea.vmem [#allocation4], %s2150_s17 }
  0x8c   : > { %s336_s27 = sshll.u32 %s328_s18, 4  ;;  %s2527_s10 = sand.u32 1, %s1965_s29   ;;  %s337_s27 = int_to_ptr.vmem [resolvable:$true] %s336_s27 }
  0x8d   : > { %s325_s19 = scalar_lea.sflag [#allocation5], %s2527_s10  ;;  %s1823_s21 = scalar_lea.hbm %s2251_s12, 64 }
  0x8e   : > { %p1824_p7 = scmp.ne.s32.totalorder %s2251_s12, %s1823_s21  ;;  %p2528_p11 = scmp.ne.s32.totalorder %s2522_s3, 0 }
  0x8f   : > { %s1828_s24 = scalar_lea.hbm %s2465_s0, 128  ;;  %p1829_p1 = scmp.lt.u32.totalorder %s2251_s12, %s2465_s0 }
  0x90   : > { %p1826_p3 = pnand %p1824_p7, %p2528_p11  ;;  %p1830_p10 = scmp.lt.u32.totalorder %s1828_s24, %s1823_s21 }
  0x91   : > { %p1832_p8 = scmp.lt.u32.totalorder %s1823_s21, %s2251_s12 }
  0x92   : > { %p1827_p13 = pneg %p1826_p3  ;;  %p1831_p6 = por %p1830_p10, %p1829_p1 }
  0x94   : > { %p1833_p12 = por %p1832_p8, %p1831_p6 }
  0x96   : > { %p1834_p0 = pnand %p1833_p12, %p1827_p13 }
  0x98   : > { %1837 = shalt.err (!%p1834_p0)
}
  0x99   : > { %s1838_s23 = scalar_lea.vmem %s337_s27, 64  ;;  %s1985_s7 = smov [#allocation4]  }
  0x9a   : > { %p1839_p5 = scmp.ne.s32.totalorder %s337_s27, %s1838_s23  ;;  %s1843_s30 = sshll.u32 %s1985_s7, 4  ;;  %s1844_s30 = int_to_ptr.vmem [resolvable:$false] %s1843_s30 }
  0x9b   : > { %s1845_s25 = scalar_lea.vmem %s1844_s30, 128  ;;  %p1846_p4 = scmp.lt.s32.totalorder %s337_s27, %s1844_s30 }
  0x9c   : > { %p1841_p9 = pnand %p1839_p5, %p2528_p11  ;;  %p1847_p7 = scmp.lt.s32.totalorder %s1845_s25, %s1838_s23 }
  0x9e   : > { %p1842_p2 = pneg %p1841_p9  ;;  %p1848_p3 = por %p1847_p7, %p1846_p4 }
  0xa0   : > { %p1849_p1 = pnand %p1848_p3, %p1842_p2 }
  0xa2   : > { %1852 = shalt.err (!%p1849_p1)
}
  0xa3   : > { %p2529_p10 = scmp.ne.s32.totalorder %s2520_s20, 0  ;;  %s2277_s10 = scalar_lea.hbm %s2467_s2, %s2153_s22 }
  0xa4   : > { %s365_s21 = scalar_lea.vmem [#allocation9], %s2150_s17  ;;  %s1853_s9 = scalar_lea.hbm %s2277_s10, 64 }
  0xa5   : > { %1604 = dma.hbm_to_vmem [thread:$0]  (!%p2529_p10), %s2251_s12, 64, %s337_s27, %s325_s19  }
  0xa6   : > { %s372_s1 = sshll.u32 %s365_s21, 4  ;;  %p1854_p13 = scmp.ne.s32.totalorder %s2277_s10, %s1853_s9  ;;  %s373_s1 = int_to_ptr.vmem [resolvable:$true] %s372_s1 }
  0xa7   : > { %s1858_s12 = scalar_lea.hbm %s2467_s2, 128  ;;  %p1859_p12 = scmp.lt.u32.totalorder %s2277_s10, %s2467_s2 }
  0xa8   : > { %p1856_p6 = pnand %p1854_p13, %p2528_p11  ;;  %p1860_p0 = scmp.lt.u32.totalorder %s1858_s12, %s1853_s9 }
  0xa9   : > { %p1862_p9 = scmp.lt.u32.totalorder %s1853_s9, %s2277_s10 }
  0xaa   : > { %p1857_p8 = pneg %p1856_p6  ;;  %p1861_p5 = por %p1860_p0, %p1859_p12 }
  0xac   : > { %p1863_p2 = por %p1862_p9, %p1861_p5 }
  0xae   : > { %p1864_p4 = pnand %p1863_p2, %p1857_p8 }
  0xb0   : > { %1867 = shalt.err (!%p1864_p4)
}
  0xb1   : > { %s1868_s17 = scalar_lea.vmem %s373_s1, 64  ;;  %s1986_s22 = smov [#allocation9]  }
  0xb2   : > { %p1869_p7 = scmp.ne.s32.totalorder %s373_s1, %s1868_s17  ;;  %s1873_s8 = sshll.u32 %s1986_s22, 4  ;;  %s1874_s8 = int_to_ptr.vmem [resolvable:$false] %s1873_s8 }
  0xb3   : > { %s1875_s23 = scalar_lea.vmem %s1874_s8, 128  ;;  %p1876_p13 = scmp.lt.s32.totalorder %s373_s1, %s1874_s8 }
  0xb4   : > { %p1871_p3 = pnand %p1869_p7, %p2528_p11  ;;  %p1877_p6 = scmp.lt.s32.totalorder %s1875_s23, %s1868_s17 }
  0xb6   : > { %p1872_p1 = pneg %p1871_p3  ;;  %p1878_p10 = por %p1877_p6, %p1876_p13 }
  0xb8   : > { %p1879_p0 = pnand %p1878_p10, %p1872_p1 }
  0xba   : > { %1882 = shalt.err (!%p1879_p0)
}
  0xbb   : > { %p2530_p12 = scmp.ne.s32.totalorder %s2520_s20, 0  ;;  %p2531_p8 = scmp.ne.s32.totalorder %s2511_s15, 0 }
  0xbc   : > { %s2301_s3 = sand.u32 (!%p2531_p8), 1, %s1961_s28   ;;  %p2532_p11 = scmp.ne.s32.totalorder (!%p2531_p8), %s2508_s13, 0 }
  0xbd   : > { %1610 = dma.hbm_to_vmem [thread:$0]  (!%p2530_p12), %s2277_s10, 64, %s373_s1, %s2174_s14  }
  0xbe   : > { %381 = sbr.rel (%p2531_p8) target bundleno = 1692 (0x69c), region = 52  ;;  %s2304_s7 = sshll.u32 (!%p2531_p8), %s2301_s3, 2 }
  0xbf   : > { %s384_s30 = scalar_lea.sflag (!%p2531_p8), [#allocation5], %s2301_s3  ;;  %s387_s25 = scalar_lea.vmem (!%p2531_p8), [#allocation4], %s2304_s7 }
  0xc5   : > { %1936 = dma.done.wait (%p2532_p11), %s384_s30, 64  }
  0xc6   : > { %1938 = vsyncadd (%p2532_p11), %s384_s30, 4294967232  ;;  %s392_s14 = sand.u32 1, %s2072_s11   ;;  %s396_s20 = scalar_lea.vmem [#allocation7], %s2304_s7 }
  0xc7   : > { %s393_s15 = scalar_lea.sflag [#allocation8], %s392_s14 }
  0xc8   : > { %1940 = dma.done.wait (%p2532_p11), %s393_s15, 128  }
  0xc9   : > { %1942 = vsyncadd (%p2532_p11), %s393_s15, 4294967168  ;;  %s405_s26 = scalar_lea.vmem [#allocation9], %s2304_s7  ;;  %p2533_p10 = scmp.eq.s32.totalorder %s2072_s11, 0 }
  0xcb   : > { %1944 = dma.done.wait (%p2533_p10), [#allocation11], 512   ;;  %p2534_p5 = pmov %p2533_p10 }
  0xcd   : > { %1946 = vsyncadd (%p2534_p5), [#allocation11], 4294966784  ;;  %p2535_p9 = pmov %p2534_p5 }
  0xce   : > { %p2536_p2 = pmov %p2534_p5 }
  0xcf   : > { %1948 = dma.done.wait (%p2535_p9), [#allocation14], 256  }
  0xd0   : > { %1950 = vsyncadd (%p2536_p2), [#allocation14], 4294967040  ;;  %v1987_v0 = vmov 0.0   ;;  %vm1988_vm0 = vmmov 0   ;;  %v1685_v1 = vld [vmem:[#allocation12] sm:$0xff]   ;;  %v1686_v2 = vld [vmem:[#allocation10] sm:$0xff]  }
  0xd1   : > { %1492 = vmatprep.subr.bf16.mxu0 %v1987_v0  ;;  %1496 = vmatprep.mubr.msk.bf16.mxu0 %vm1988_vm0, %v1987_v0  ;;  %v1687_v3 = vld [vmem:[#allocation12 + $0x8] sm:$0xff]   ;;  %v1688_v4 = vld [vmem:[#allocation10 + $0x8] sm:$0xff]   ;;  %vm506_vm1 = vcmask 261120   ;;  %v467_v5 = vld [vmem:[%s396_s20] sm:$0xf]  ;;  %s1989_s11 = smov 120  }
  0xd2   : > { %563 = vxpose.xlu0.c.b16.start [1/2] (short) (narrow) %v1685_v1, 32  ;;  %1493 = vmatpush3.bf16.msra.mxu0 %v1686_v2  ;;  %v466_v6 = vld [vmem:[%s387_s25] sm:$0xf]  ;;  %v586_v7 = vsel %vm506_vm1, %v467_v5, 0  ;;  %s1990_s13 = smov 104   ;;  %v1689_v15 = vld [vmem:[%s2470_s5] sm:$0xff]  }
  0xd3   : > { %1494 = vmatprep.subr.bf16.mxu0 %v1987_v0  ;;  %1570 = vmatprep.subr.msk.bf16.mxu1 %vm506_vm1, %v467_v5  ;;  %s1991_s21 = smov 112   ;;  %v1690_v16 = vld [vmem:[%s2470_s5 + $0x8] sm:$0xff]   ;;  %vm699_vm2 = vcmask 1043456   ;;  %vm695_vm3 = vcmask 64512   ;;  %vm802_vm4 = vcmask 60416   ;;  %s1992_s24 = smov 8  }
  0xd4   : > { %1501 = vmatpush3.bf16.xpose.msra.mxu1 %v586_v7  ;;  %v468_v17 = vld [vmem:[%s405_s26] sm:$0xf]  ;;  %s1993_s16 = smov 16   ;;  %s1994_s12 = smov 24   ;;  %vm923_vm5 = vcmask 126016   ;;  %vm1040_vm6 = vcmask 191616  }
  0xd5   : > { %1514 = vmatprep.subr.bf16.mxu1 %v1987_v0  ;;  %s2537_s27 = sld [smem:[#allocation22_spill]]  ;;  %vm1159_vm7 = vcmask 257216   ;;  %s1431_s19 = sshll.u32 %s2301_s3, 3 }
  0xd6   : > { %564 = vxpose.xlu0.c.b16.end [2/2] (short) (narrow) %v1687_v3, 32  ;;  %1495 = vmatpush3.bf16.msra.mxu0 %v1688_v4  ;;  %s2538_s8 = sld [smem:[#allocation31_spill]]  ;;  %s2539_s23 = sld [smem:[#allocation27_spill]] }
  0xd7   : > { %1506 = vmatprep.subr.bf16.mxu0 %v1987_v0  ;;  %s459_s30 = scalar_lea.vmem [#allocation15], %s1431_s19  ;;  %s2540_s20 = sld [smem:[#allocation32_spill]] }
  0xd8   : > { %s1248_s25 = sshll.u32 %s459_s30, 4  ;;  %s1995_s18 = smov [#allocation15]   ;;  %s2418_s25 = int_to_ptr.vmem [resolvable:$true] %s1248_s25 }
  0xd9   : > { %1497 = vmatmul.mubr.msk.bf16.vlgmr.msra.gmra.mrb[0].mxu0 %vm506_vm1, %v466_v6  ;;  %s1887_s10 = sshll.u32 %s1995_s18, 4  ;;  %s1888_s10 = int_to_ptr.vmem [resolvable:$false] %s1887_s10 }
  0xda   : > { %1510 = vmatprep.mubr.msk.bf16.mxu0 %vm1988_vm0, %v1987_v0  ;;  %1507 = vmatpush3.bf16.msra.mxu0 %v1689_v15  ;;  %p1890_p13 = scmp.lt.s32.totalorder %s2418_s25, %s1888_s10 }
  0xdb   : > { %1508 = vmatprep.subr.bf16.mxu0 %v1987_v0  ;;  %s1458_s7 = sshll.u32 %s2537_s27, 7 }
  0xdc   : > { %p2541_p7 = scmp.ne.s32.totalorder %s2539_s23, 0 }
  0xdd   : > { %s2416_s26 = scalar_lea.hbm %s2540_s20, %s1458_s7 }
  0xde   : > { %1509 = vmatpush3.bf16.msra.mxu0 %v1690_v16 }
  0xdf   : > { %1520 = vmatprep.subr.bf16.mxu0 %v1987_v0 }
  0xe1   : > { %1511 = vmatmul.mubr.msk.bf16.vlgmr.msra.gmra.mrb[4].mxu0 %vm506_vm1, %v468_v17 }
  0xe2   : > { %1522 = vmatprep.mubr.msk.bf16.mxu0 %vm1988_vm0, %v1987_v0 }
 0x138   : > { %v571_v8 = vpop.trf.xlu0 }
 0x139   : > { %1502 = vmatprep.mubr.msk.bf16.mxu1 %vm506_vm1, %v571_v8 }
 0x13c   : > { %v572_v9 = vpop.trf.xlu0 }
 0x13d   : > { %1503 = vmatmul.mubr.msk.bf16.vlgmr.msra.gmra.mrb[0].mxu1 %vm506_vm1, %v572_v9 }
 0x13e   : > { %1516 = vmatprep.mubr.msk.bf16.mxu1 %vm1988_vm0, %v1987_v0 }
 0x1ac   : > { %v544_v10 = vpop.f32.mrb[0].mxu0 }
 0x1ad   : > { %v550_v11 = vpack.c.bf16 %v544_v10, %v544_v10  ;;  %v1498_v12 = vpop.f32.mrb[1].mxu0 }
 0x1ae   : > { %v547_v13 = vpop.f32.mrb[2].mxu0 }
 0x1af   : > { %805 = vrot.lane.b32.xlu1 %v550_v11, %s1989_s11  ;;  %1042 = vrot.lane.b32.xlu0 %v550_v11, %s1990_s13  ;;  %v1499_v14 = vpop.f32.mrb[3].mxu0 }
 0x1b3   : > { %925 = vrot.lane.b32.xlu1 %v550_v11, %s1991_s21 }
 0x1b4   : > { %v688_v53 = vpop.f32.mrb[4].mxu0 }
 0x1b5   : > { %v694_v54 = vpack.c.bf16 %v688_v53, %v688_v53  ;;  %v1512_v55 = vpop.f32.mrb[5].mxu0 }
 0x1b6   : > { %v691_v56 = vpop.f32.mrb[6].mxu0 }
 0x1b7   : > { %v1513_v57 = vpop.f32.mrb[7].mxu0  ;;  %v759_v58 = vsel %vm699_vm2, %v694_v54, 0 }
 0x1b8   : > { %1521 = vmatpush3.bf16.msra.mxu0 %v759_v58 }
 0x1b9   : > { %1532 = vmatprep.subr.bf16.mxu0 %v1987_v0 }
 0x210   : > { %v1504_v18 = vpop.f32.mrb[0].mxu1 }
 0x211   : > { %v622_v19 = vpop.f32.mrb[1].mxu1 }
 0x212   : > { %v1505_v20 = vpop.f32.mrb[2].mxu1 }
 0x213   : > { %v638_v21 = vpack.c.bf16 %v1505_v20, %v1504_v18  ;;  %v625_v22 = vpop.f32.mrb[3].mxu1 }
 0x214   : > { %v637_v23 = vpack.c.bf16 %v625_v22, %v622_v19 }
 0x215   : > { %v931_v28 = vsel %vm699_vm2, %v638_v21, 0  ;;  %v1045_v29 = vrot.slane %v638_v21, 4 }
 0x216   : > { %v701_v24 = vsel %vm699_vm2, %v637_v23, 0  ;;  %v808_v25 = vrot.slane %v637_v23, 4 }
 0x217   : > { %1515 = vmatpush3.bf16.msra.mxu1 %v701_v24  ;;  %v1050_v31 = vsel %vm699_vm2, %v1045_v29, 0 }
 0x218   : > { %1526 = vmatprep.subr.bf16.mxu1 %v1987_v0  ;;  %v813_v26 = vsel %vm699_vm2, %v808_v25, 0 }
 0x21a   : > { %1517 = vmatmul.mubr.msk.bf16.vlgmr.msra.gmra.mrb[4].mxu1 %vm695_vm3, %v550_v11 }
 0x21b   : > { %1527 = vmatpush3.bf16.msra.mxu1 %v813_v26  ;;  %1528 = vmatprep.mubr.msk.bf16.mxu1 %vm1988_vm0, %v1987_v0 }
 0x21c   : > { %1538 = vmatprep.subr.bf16.mxu1 %v1987_v0 }
 0x221   : > { %v806_v27 = vpop.permute.xlu1 %805  ;;  %v1043_v32 = vpop.permute.xlu0 %1042 }
 0x222   : > { %1529 = vmatmul.mubr.msk.bf16.vlgmr.msra.gmra.mrb[8].mxu1 %vm695_vm3, %v806_v27 }
 0x223   : > { %1539 = vmatpush3.bf16.msra.mxu1 %v931_v28  ;;  %1540 = vmatprep.mubr.msk.bf16.mxu1 %vm1988_vm0, %v1987_v0 }
 0x224   : > { %1550 = vmatprep.subr.bf16.mxu1 %v1987_v0 }
 0x225   : > { %v926_v30 = vpop.permute.xlu1 %925 }
 0x22a   : > { %1541 = vmatmul.mubr.msk.bf16.vlgmr.msra.gmra.mrb[12].mxu1 %vm695_vm3, %v926_v30 }
 0x22b   : > { %1551 = vmatpush3.bf16.msra.mxu1 %v1050_v31  ;;  %1552 = vmatprep.mubr.msk.bf16.mxu1 %vm1988_vm0, %v1987_v0 }
 0x22c   : > { %1562 = vmatprep.subr.bf16.mxu1 %v1987_v0 }
 0x232   : > { %1553 = vmatmul.mubr.msk.bf16.vlgmr.msra.gmra.mrb[16].mxu1 %vm695_vm3, %v1043_v32 }
 0x233   : > { %1566 = vmatprep.mubr.msk.bf16.mxu1 %vm1988_vm0, %v1987_v0 }
 0x2ed   : > { %v737_v33 = vpop.f32.mrb[4].mxu1 }
 0x2ee   : > { %v1518_v34 = vpop.f32.mrb[5].mxu1  ;;  %v743_v35 = vsel %vm695_vm3, %v737_v33, -inf }
 0x2ef   : > { %744 = vmax.xlane.f32.xlu1 %v743_v35  ;;  %v740_v36 = vpop.f32.mrb[6].mxu1 }
 0x2f0   : > { %v1519_v37 = vpop.f32.mrb[7].mxu1 }
 0x2f5   : > { %v849_v38 = vpop.f32.mrb[8].mxu1 }
 0x2f6   : > { %v855_v39 = vsel %vm695_vm3, %v849_v38, -inf  ;;  %v1530_v40 = vpop.f32.mrb[9].mxu1 }
 0x2f7   : > { %856 = vmax.xlane.f32.xlu0 %v855_v39  ;;  %v852_v41 = vpop.f32.mrb[10].mxu1 }
 0x2f8   : > { %v1531_v42 = vpop.f32.mrb[11].mxu1 }
 0x2fd   : > { %v967_v43 = vpop.f32.mrb[12].mxu1 }
 0x2fe   : > { %v973_v44 = vsel %vm695_vm3, %v967_v43, -inf  ;;  %v1542_v45 = vpop.f32.mrb[13].mxu1 }
 0x2ff   : > { %974 = vmax.xlane.f32.xlu1 %v973_v44  ;;  %v970_v46 = vpop.f32.mrb[14].mxu1 }
 0x300   : > { %v1543_v47 = vpop.f32.mrb[15].mxu1 }
 0x305   : > { %v1086_v48 = vpop.f32.mrb[16].mxu1 }
 0x306   : > { %v1092_v49 = vsel %vm695_vm3, %v1086_v48, -inf  ;;  %v1554_v50 = vpop.f32.mrb[17].mxu1 }
 0x307   : > { %1093 = vmax.xlane.f32.xlu0 %v1092_v49  ;;  %v1089_v51 = vpop.f32.mrb[18].mxu1  ;;  %v1692_v50 = vld [vmem:[#allocation13 + $0x8] sm:$0xff]  }
 0x308   : > { %v1555_v52 = vpop.f32.mrb[19].mxu1 }
 0x37c   : > { %v745_v59 = vpop.xlane.xlu1 %744 }
 0x37d   : > { %v746_v60 = vsub.f32 %v737_v33, %v745_v59 }
 0x37f   : > { %v747_v61 = vmul.f32 1.442695, %v746_v60 }
 0x381   : > { %1693 = vpow2.f32 %v747_v61 }
 0x384   : > { %v857_v62 = vpop.xlane.xlu0 %856 }
 0x385   : > { %v858_v63 = vsub.f32 %v849_v38, %v857_v62 }
 0x387   : > { %v859_v1 = vmul.f32 1.442695, %v858_v63  ;;  %v1456_v63 = vld [vmem:[%s2538_s8] ss:$0 sm:$0xff] }
 0x389   : > { %1695 = vpow2.f32 %v859_v1 }
 0x38b   : > { %v1694_v2 = vpop.eup %1693 }
 0x38c   : > { %v749_v3 = vsel %vm695_vm3, %v1694_v2, 0.0  ;;  %v975_v11 = vpop.xlane.xlu1 %974 }
 0x38d   : > { %750 = vadd.xlane.f32.xlu1 %v749_v3  ;;  %v976_v12 = vsub.f32 %v967_v43, %v975_v11 }
 0x38f   : > { %v977_v13 = vmul.f32 1.442695, %v976_v12 }
 0x393   : > { %v1696_v4 = vpop.eup %1695 }
 0x394   : > { %v1094_v5 = vpop.xlane.xlu0 %1093  ;;  %v861_v6 = vsel %vm695_vm3, %v1696_v4, 0.0 }
 0x395   : > { %v1095_v7 = vsub.f32 %v1086_v48, %v1094_v5  ;;  %862 = vadd.xlane.f32.xlu0 %v861_v6  ;;  %v1691_v48 = vld [vmem:[#allocation13] sm:$0xff]  }
 0x396   : > { %1563 = vmatpush3.bf16.msra.mxu1 %v1691_v48 }
 0x397   : > { %v1096_v8 = vmul.f32 1.442695, %v1095_v7  ;;  %1564 = vmatprep.subr.bf16.mxu1 %v1987_v0 }
 0x399   : > { %1697 = vpow2.f32 %v1096_v8 }
 0x39a   : > { %1699 = vpow2.f32 %v977_v13  ;;  %1565 = vmatpush3.bf16.msra.mxu1 %v1692_v50 }
 0x39e   : > { %868 = vrot.lane.b32.xlu1 %v694_v54, %s1989_s11  ;;  %s1234_s11 = scalar_lea.sflag [#allocation6], %s2301_s3 }
 0x3a3   : > { %v1698_v9 = vpop.eup %1697 }
 0x3a4   : > { %v1098_v10 = vsel %vm695_vm3, %v1698_v9, 0.0  ;;  %v1700_v14 = vpop.eup %1699 }
 0x3a5   : > { %1099 = vadd.xlane.f32.xlu0 %v1098_v10  ;;  %v979_v15 = vsel %vm695_vm3, %v1700_v14, 0.0 }
 0x3bb   : > { %985 = vrot.lane.b32.xlu0 %v694_v54, %s1991_s21  ;;  %s1889_s21 = scalar_lea.vmem %s1888_s10, 256 }
 0x3c2   : > { %980 = vadd.xlane.f32.xlu1 %v979_v15 }
 0x3d3   : > { %1104 = vrot.lane.b32.xlu1 %v694_v54, %s1990_s13  ;;  %s1883_s13 = scalar_lea.vmem %s2418_s25, 128 }
 0x3d4   : > { %p1884_p4 = scmp.ne.s32.totalorder %s2418_s25, %s1883_s13  ;;  %p1891_p6 = scmp.lt.s32.totalorder %s1889_s21, %s1883_s13 }
 0x3d6   : > { %p1885_p3 = pnand %p1884_p4, %p2541_p7  ;;  %p1892_p0 = por %p1891_p6, %p1890_p13 }
 0x3d8   : > { %p1886_p1 = pneg %p1885_p3 }
 0x3da   : > { %p1893_p12 = pnand %p1892_p0, %p1886_p1 }
 0x41a   : > { %v751_v16 = vpop.xlane.xlu1 %750 }
 0x41b   : > { %1701 = vrcp.f32 %v751_v16 }
 0x41e   : > { %v869_v20 = vpop.permute.xlu1 %868 }
 0x41f   : > { %v874_v22 = vsel %vm699_vm2, %v869_v20, 0 }
 0x422   : > { %v863_v17 = vpop.xlane.xlu0 %862 }
 0x423   : > { %1703 = vrcp.f32 %v863_v17 }
 0x425   : > { %v1702_v18 = vpop.eup %1701 }
 0x426   : > { %v753_v19 = vmul.f32 %v1702_v18, %v1694_v2 }
 0x428   : > { %v754_v21 = vpack.c.bf16 %v753_v19, %v753_v19 }
 0x42a   : > { %1523 = vmatmul.mubr.msk.bf16.vlgmr.msra.gmra.mrb[8].mxu0 %vm695_vm3, %v754_v21 }
 0x42b   : > { %1533 = vmatpush3.bf16.msra.mxu0 %v874_v22  ;;  %1534 = vmatprep.mubr.msk.bf16.mxu0 %vm1988_vm0, %v1987_v0 }
 0x42c   : > { %1544 = vmatprep.subr.bf16.mxu0 %v1987_v0 }
 0x42d   : > { %v1704_v23 = vpop.eup %1703 }
 0x42e   : > { %v865_v24 = vmul.f32 %v1704_v23, %v1696_v4 }
 0x430   : > { %v866_v25 = vpack.c.bf16 %v865_v24, %v865_v24 }
 0x432   : > { %v1100_v26 = vpop.xlane.xlu0 %1099  ;;  %1535 = vmatmul.mubr.msk.bf16.vlgmr.msra.gmra.mrb[12].mxu0 %vm695_vm3, %v866_v25 }
 0x433   : > { %1546 = vmatprep.mubr.msk.bf16.mxu0 %vm1988_vm0, %v1987_v0 }
 0x436   : > { %v986_v27 = vpop.permute.xlu0 %985 }
 0x437   : > { %v991_v28 = vsel %vm699_vm2, %v986_v27, 0 }
 0x438   : > { %1545 = vmatpush3.bf16.msra.mxu0 %v991_v28 }
 0x439   : > { %1556 = vmatprep.subr.bf16.mxu0 %v1987_v0 }
 0x44f   : > { %v981_v29 = vpop.xlane.xlu1 %980 }
 0x450   : > { %1705 = vrcp.f32 %v981_v29 }
 0x451   : > { %1707 = vrcp.f32 %v1100_v26 }
 0x453   : > { %v1105_v32 = vpop.permute.xlu1 %1104 }
 0x454   : > { %v1110_v35 = vsel %vm699_vm2, %v1105_v32, 0 }
 0x45a   : > { %v1706_v30 = vpop.eup %1705 }
 0x45b   : > { %v983_v31 = vmul.f32 %v1706_v30, %v1700_v14  ;;  %v1708_v34 = vpop.eup %1707 }
 0x45c   : > { %v1102_v36 = vmul.f32 %v1708_v34, %v1698_v9 }
 0x45d   : > { %v984_v33 = vpack.c.bf16 %v983_v31, %v983_v31 }
 0x45e   : > { %v1103_v37 = vpack.c.bf16 %v1102_v36, %v1102_v36 }
 0x45f   : > { %1547 = vmatmul.mubr.msk.bf16.vlgmr.msra.gmra.mrb[16].mxu0 %vm695_vm3, %v984_v33 }
 0x460   : > { %1557 = vmatpush3.bf16.msra.mxu0 %v1110_v35  ;;  %1558 = vmatprep.mubr.msk.bf16.mxu0 %vm1988_vm0, %v1987_v0 }
 0x467   : > { %1559 = vmatmul.mubr.msk.bf16.vlgmr.msra.gmra.mrb[20].mxu0 %vm695_vm3, %v1103_v37 }
 0x4fd   : > { %v795_v38 = vpop.f32.mrb[8].mxu0 }
 0x4fe   : > { %v801_v39 = vpack.c.bf16 %v795_v38, %v795_v38  ;;  %v1524_v40 = vpop.f32.mrb[9].mxu0 }
 0x4ff   : > { %v798_v41 = vpop.f32.mrb[10].mxu0 }
 0x500   : > { %803 = vst.msk [vmem:[#allocation3] sm:$0xf] %vm802_vm4, %v801_v39  ;;  %v1525_v42 = vpop.f32.mrb[11].mxu0 }
 0x505   : > { %v910_v43 = vpop.f32.mrb[12].mxu0 }
 0x506   : > { %v1461_v44 = vpack.c.bf16 %v910_v43, %v910_v43  ;;  %v1536_v45 = vpop.f32.mrb[13].mxu0 }
 0x507   : > { %v913_v46 = vpop.f32.mrb[14].mxu0 }
 0x508   : > { %920 = vrot.lane.b32.xlu1 %v1461_v44, %s1992_s24  ;;  %v1537_v47 = vpop.f32.mrb[15].mxu0 }
 0x532   : > { %v1027_v49 = vpop.f32.mrb[16].mxu0 }
 0x533   : > { %v1462_v51 = vpack.c.bf16 %v1027_v49, %v1027_v49  ;;  %v1548_v52 = vpop.f32.mrb[17].mxu0 }
 0x534   : > { %v1030_v53 = vpop.f32.mrb[18].mxu0 }
 0x535   : > { %1037 = vrot.lane.b32.xlu1 %v1462_v51, %s1993_s16  ;;  %v1549_v54 = vpop.f32.mrb[19].mxu0 }
 0x53a   : > { %v1146_v55 = vpop.f32.mrb[20].mxu0 }
 0x53b   : > { %v1463_v56 = vpack.c.bf16 %v1146_v55, %v1146_v55  ;;  %v1560_v57 = vpop.f32.mrb[21].mxu0 }
 0x53c   : > { %v1149_v58 = vpop.f32.mrb[22].mxu0 }
 0x53d   : > { %1156 = vrot.lane.b32.xlu0 %v1463_v56, %s1994_s12  ;;  %v1561_v59 = vpop.f32.mrb[23].mxu0 }
 0x57a   : > { %v921_v60 = vpop.permute.xlu1 %920 }
 0x57b   : > { %924 = vst.msk [vmem:[#allocation3] sm:$0xf] %vm923_vm5, %v921_v60 }
 0x5a7   : > { %v1038_v61 = vpop.permute.xlu1 %1037 }
 0x5a8   : > { %1041 = vst.msk [vmem:[#allocation3] sm:$0xf] %vm1040_vm6, %v1038_v61 }
 0x5af   : > { %v1157_v0 = vpop.permute.xlu0 %1156 }
 0x5b0   : > { %1160 = vst.msk [vmem:[#allocation3] sm:$0xf] %vm1159_vm7, %v1157_v0 }
 0x5b7   : > { %v1162_v62 = vld [vmem:[#allocation3] sm:$0xf] }
 0x5b8   : > { %1567 = vmatmul.mubr.msk.bf16.vlgmr.msra.gmra.mrb[20].mxu1 %vm506_vm1, %v1162_v62 }
 0x68b   : > { %v1212_v1 = vpop.f32.mrb[20].mxu1 }
 0x68c   : > { %v1231_v2 = vadd.f32 %v1456_v63, %v1212_v1  ;;  %v1568_v3 = vpop.f32.mrb[21].mxu1 }
 0x68d   : > { %v1215_v4 = vpop.f32.mrb[22].mxu1 }
 0x68e   : > { %1232 = vst [vmem:[%s459_s30] sm:$0xff] %v1231_v2  ;;  %v1569_v5 = vpop.f32.mrb[23].mxu1 }
 0x68f   : > { %1896 = shalt.err (!%p1893_p12)
}
 0x690   : > { %s1897_s3 = scalar_lea.hbm %s2416_s26, 128  ;;  %s1901_s24 = scalar_lea.hbm %s2540_s20, 256 }
 0x691   : > { %p1898_p8 = scmp.ne.s32.totalorder %s2416_s26, %s1897_s3  ;;  %p1902_p5 = scmp.lt.u32.totalorder %s2416_s26, %s2540_s20 }
 0x692   : > { %p1903_p9 = scmp.lt.u32.totalorder %s1901_s24, %s1897_s3  ;;  %p1905_p4 = scmp.lt.u32.totalorder %s1897_s3, %s2416_s26 }
 0x693   : > { %p1899_p11 = pnand %p1898_p8, %p2541_p7 }
 0x694   : > { %p1904_p2 = por %p1903_p9, %p1902_p5 }
 0x695   : > { %p1900_p10 = pneg %p1899_p11 }
 0x696   : > { %p1906_p3 = por %p1905_p4, %p1904_p2 }
 0x698   : > { %p1907_p1 = pnand %p1906_p3, %p1900_p10 }
 0x69a   : > { %1910 = shalt.err (!%p1907_p1)
}
 0x69b   : > { %1589 = dma.vmem_to_hbm [thread:$0]  (%p2541_p7), %s2418_s25, 128, %s2416_s26, %s1234_s11  }
 0x69c PF: > { %s2542_s27 = sld [smem:[#allocation21_spill]]  ;;  %s2543_s19 = sld [smem:[#allocation25_spill]] }
 0x69d   : > { %s2544_s17 = sld [smem:[#allocation24_spill]] }
 0x6a2   : > { %s1260_s22 = sand.u32 1, %s2542_s27   ;;  %p2545_p13 = scmp.ne.s32.totalorder %s2543_s19, 0 }
 0x6a3   : > { %p2546_p6 = scmp.ge.s32.totalorder %s2544_s17, 2  ;;  %s1261_s8 = scalar_lea.sflag [#allocation6], %s1260_s22 }
 0x6a5   : > { %p1612_p0 = pnand %p2546_p6, %p2545_p13 }
 0x6a7   : > { %1952 = dma.done.wait (!%p1612_p0), %s1261_s8, 128  }
 0x6a8   : > { %1954 = vsyncadd (!%p1612_p0), %s1261_s8, 4294967168  ;;  %s29_s10 = sadd.s32 1, %s2544_s17   ;;  %s2547_s23 = sld [smem:[#allocation28_spill]] }
 0x6a9   : > { %p26_p12 = scmp.ge.s32.totalorder %s29_s10, 4   ;;  %s2548_s30 = sld [smem:[#allocation23_spill]] }
 0x6aa   : > { %s2549_s9 = sld [smem:[#allocation26_spill]]  ;;  %s2550_s27 = smov %s1961_s28 }
 0x6ab   : > { %s2551_s28 = smov %s1965_s29  ;;  %28 = sbr.rel (!%p26_p12) target bundleno = 15 (0xf), region = 145 }
 0x6ae   : > { %s2552_s29 = smov %s2547_s23 }
 0x6b2   :  { %1266 = vsyncpa [#allocation5], 1 }
 0x6b3   :  { %1268 = vsyncpa [#allocation5 + $0x1], 1 }
 0x6b4   :  { %1269 = vsyncpa [#allocation8], 1 }
 0x6b5   :  { %1271 = vsyncpa [#allocation8 + $0x1], 1 }
 0x6b6   :  { %1272 = vsyncpa [#allocation11], 1 }
 0x6b7   :  { %1273 = vsyncpa [#allocation14], 1 }
 0x6b8   :  { %1274 = vsyncpa [#allocation6], 1 }
 0x6b9   :  { %1276 = vsyncpa [#allocation6 + $0x1], 1 }

</bundles_post_ra>
